<compile_context>
chip_gen: v7x
topology: tpu7x:2x2x1
jax: 0.10.0
libtpu: 0.0.40
codegen_flags: <defaults>
</compile_context>

<pallas_src>
import functools
import math

import jax
import jax.numpy as jnp
import numpy as np
from jax.experimental import pallas as pl
from jax.experimental.pallas import tpu as pltpu


# ---------------------------------------------------------------------------
# Kernel 1: K/V projection   k = c @ Wk, v = c @ Wv   -> head-major bf16.
# ---------------------------------------------------------------------------
def _kv_proj_kernel(c_ref, wk_ref, wv_ref, k_ref, v_ref, *, num_heads, head_dim):
    c = c_ref[0]                                                      # (TM, Dc) bf16
    k = jnp.dot(c, wk_ref[...], preferred_element_type=jnp.float32)   # (TM, D) f32
    v = jnp.dot(c, wv_ref[...], preferred_element_type=jnp.float32)
    for h in range(num_heads):                   # one-time head split (lane slices)
        lo = h * head_dim
        k_ref[0, h] = k[:, lo:lo + head_dim].astype(k_ref.dtype)
        v_ref[0, h] = v[:, lo:lo + head_dim].astype(v_ref.dtype)


# ---------------------------------------------------------------------------
# Kernel 2: LN -> Q proj -> flash cross-attention -> out proj -> FeedForward.
# ---------------------------------------------------------------------------
def _flash_query_kernel(x_ref, k_ref, v_ref,
                        wq_ref, wo_ref, bo_ref,
                        w1_ref, b1_ref, w2_ref, b2_ref,
                        out_ref,
                        q_sc, m_sc, l_sc, acc_sc,
                        *, num_heads, head_dim, scale):
    kv = pl.program_id(2)
    n_kv = pl.num_programs(2)
    H, hd = num_heads, head_dim

    # ---- per (batch, q_tile) init at first KV step: LN + full-width Q proj ----
    @pl.when(kv == 0)
    def _init():
        x = x_ref[0]                                                  # (TN, D) f32
        mean = jnp.mean(x, axis=-1, keepdims=True)
        var = jnp.mean((x - mean) ** 2, axis=-1, keepdims=True)
        xn = ((x - mean) * jax.lax.rsqrt(var + 1e-6)).astype(jnp.bfloat16)
        q = jnp.dot(xn, wq_ref[...],
                    preferred_element_type=jnp.float32) * scale       # (TN, D) f32
        for h in range(H):                       # split once into head-major scratch
            lo = h * hd
            q_sc[h] = q[:, lo:lo + hd].astype(jnp.bfloat16)
        m_sc[...] = jnp.full_like(m_sc, -jnp.inf)
        l_sc[...] = jnp.zeros_like(l_sc)
        acc_sc[...] = jnp.zeros_like(acc_sc)

    # ---- online-softmax attention update for this KV tile (heads batched) ----
    q = q_sc[...]                                  # (H, TN, hd) bf16, pre-scaled
    k = k_ref[0]                                   # (H, TM, hd) bf16 (pre-projected)
    v = v_ref[0]                                   # (H, TM, hd) bf16
    s = jnp.einsum('hnd,hmd->hnm', q, k,
                   preferred_element_type=jnp.float32)                # (H, TN, TM)
    m_cur = jnp.max(s, axis=-1, keepdims=True)
    m_new = jnp.maximum(m_sc[...], m_cur)
    alpha = jnp.exp(m_sc[...] - m_new)
    p = jnp.exp(s - m_new)                                            # f32
    l_sc[...] = alpha * l_sc[...] + jnp.sum(p, axis=-1, keepdims=True)
    acc_sc[...] = alpha * acc_sc[...] + jnp.einsum(
        'hnm,hmd->hnd', p.astype(jnp.bfloat16), v,
        preferred_element_type=jnp.float32)                           # (H, TN, hd)
    m_sc[...] = m_new

    # ---- finalize: normalize, head concat, full-K out proj, FeedForward ----
    @pl.when(kv == n_kv - 1)
    def _finalize():
        inv_l = pl.reciprocal(l_sc[...], approx=True)                 # (H, TN, 1)
        heads = [(acc_sc[h] * inv_l[h]).astype(jnp.bfloat16) for h in range(H)]
        attn = jnp.concatenate(heads, axis=-1)                        # (TN, D) bf16
        o = jnp.dot(attn, wo_ref[...],
                    preferred_element_type=jnp.float32) + bo_ref[...] # (TN, D) f32
        h1 = jnp.dot(o.astype(jnp.bfloat16), w1_ref[...],
                     preferred_element_type=jnp.float32) + b1_ref[...]
        g = jax.nn.gelu(h1, approximate=False)
        y = jnp.dot(g.astype(jnp.bfloat16), w2_ref[...],
                    preferred_element_type=jnp.float32) + b2_ref[...]
        out_ref[0] = y.astype(out_ref.dtype)


def _pick_tile(n, target, aligns):
    """Largest divisor of n that is <= target and a multiple of one of `aligns`
    (preferred in order).  Falls back to the full dimension when no aligned
    divisor exists — that fallback is *required* by the TPU (8,128) block rule
    (a block dim must be 8/128-aligned or equal to the full array dim)."""
    if n <= target:
        return n
    divisors = [t for t in range(1, target + 1) if n % t == 0]
    for a in aligns:
        cand = [t for t in divisors if t % a == 0]
        if cand:
            return max(cand)
    return n


def flash_query_layer(x, c, params, num_heads, *,
                      tile_n=256, tile_m=256, tile_m_proj=256,
                      vmem_limit_bytes=None):
    """x: (B, N, D) float32; c: (B, M, Dc) float32.

    params = (Wq, Wk, Wv, Wo, bo, W1, b1, W2, b2), weights in (in, out) layout.
    """
    B, N, D = x.shape
    _, M, Dc = c.shape
    assert D % num_heads == 0, "dim must be divisible by num_heads"
    H = num_heads
    hd = D // H

    wq, wk, wv, wo, bo, w1, b1, w2, b2 = params

    # Wrapper-side dtype plumbing only (one-time XLA casts, bf16 MXU operands).
    bf = jnp.bfloat16
    c_bf = c.astype(bf)
    wq_b, wk_b, wv_b, wo_b = (w.astype(bf) for w in (wq, wk, wv, wo))
    w1_b, w2_b = w1.astype(bf), w2.astype(bf)
    bo32, b132, b232 = (b.astype(jnp.float32) for b in (bo, b1, b2))

    # ------------------------------------------------------------------
    # Pallas kernel 1: project K/V once per batch (head-major bf16 output).
    # ------------------------------------------------------------------
    TMp = _pick_tile(M, tile_m_proj, aligns=(128, 8))
    proj_flops = int(4 * B * M * Dc * D)
    proj_bytes = int(2 * B * M * Dc + 2 * (wk.size + wv.size) + 2 * 2 * B * M * D)
    k_hm, v_hm = pl.pallas_call(
        functools.partial(_kv_proj_kernel, num_heads=H, head_dim=hd),
        out_shape=(jax.ShapeDtypeStruct((B, H, M, hd), bf),
                   jax.ShapeDtypeStruct((B, H, M, hd), bf)),
        grid_spec=pltpu.PrefetchScalarGridSpec(
            num_scalar_prefetch=0,
            grid=(B, M // TMp),
            in_specs=[
                pl.BlockSpec((1, TMp, Dc), lambda b, m: (b, m, 0)),   # c (bf16)
                pl.BlockSpec((Dc, D), lambda b, m: (0, 0)),           # Wk
                pl.BlockSpec((Dc, D), lambda b, m: (0, 0)),           # Wv
            ],
            out_specs=(pl.BlockSpec((1, H, TMp, hd), lambda b, m: (b, 0, m, 0)),
                       pl.BlockSpec((1, H, TMp, hd), lambda b, m: (b, 0, m, 0)))),
        compiler_params=pltpu.CompilerParams(
            dimension_semantics=("parallel", "parallel")),
        cost_estimate=pl.CostEstimate(flops=proj_flops, transcendentals=0,
                                      bytes_accessed=proj_bytes),
    )(c_bf, wk_b, wv_b)

    # ------------------------------------------------------------------
    # Pallas kernel 2: LN + Q proj + flash attention + out proj + FF.
    # ------------------------------------------------------------------
    TN = _pick_tile(N, tile_n, aligns=(8,))
    TM = _pick_tile(M, tile_m, aligns=(128, 8))
    n_q, n_kv = N // TN, M // TM

    if vmem_limit_bytes is None:
        def _nbytes(shape, dt):
            return int(np.prod(shape)) * jnp.dtype(dt).itemsize
        blocks = (_nbytes((1, TN, D), jnp.float32)              # x
                  + 2 * _nbytes((1, H, TM, hd), bf)             # K, V tiles
                  + _nbytes((1, TN, D), x.dtype))               # out
        weights = (4 * _nbytes((D, D), bf)                      # Wq, Wo, W1, W2
                   + 3 * _nbytes((1, D), jnp.float32))          # bo, b1, b2
        scratch = (_nbytes((H, TN, hd), bf)
                   + 2 * _nbytes((H, TN, 1), jnp.float32)
                   + _nbytes((H, TN, hd), jnp.float32))
        temps = 3 * _nbytes((H, TN, TM), jnp.float32)           # s / p / exp values
        need = 2 * (blocks + weights) + scratch + temps + (4 << 20)
        # Cap at 64 MiB so the same budget is legal on v7x; v5e/v6e users can
        # pass a larger explicit limit for bigger tiles.
        vmem_limit_bytes = int(min(max(need, 32 << 20), 64 << 20))

    kernel = functools.partial(_flash_query_kernel, num_heads=H, head_dim=hd,
                               scale=1.0 / math.sqrt(hd))

    flops = int(2 * B * N * D * D            # Q projection
                + 4 * B * N * M * D          # QK^T + PV (all heads)
                + 2 * B * N * D * D          # output projection
                + 4 * B * N * D * D)         # FF (mult=1): two DxD matmuls
    transcendentals = int(B * H * N * M + B * N * D)
    bytes_accessed = int(4 * x.size + 4 * B * N * D
                         + 2 * 2 * B * M * D * n_q               # K,V per q tile
                         + 2 * 4 * D * D + 3 * 4 * D)

    wmap2 = lambda b, qi, kv: (0, 0)

    return pl.pallas_call(
        kernel,
        out_shape=jax.ShapeDtypeStruct((B, N, D), x.dtype),
        grid_spec=pltpu.PrefetchScalarGridSpec(
            num_scalar_prefetch=0,
            grid=(B, n_q, n_kv),
            in_specs=[
                pl.BlockSpec((1, TN, D), lambda b, qi, kv: (b, qi, 0)),        # x
                pl.BlockSpec((1, H, TM, hd), lambda b, qi, kv: (b, 0, kv, 0)), # K
                pl.BlockSpec((1, H, TM, hd), lambda b, qi, kv: (b, 0, kv, 0)), # V
                pl.BlockSpec((D, D), wmap2),     # Wq
                pl.BlockSpec((D, D), wmap2),     # Wo (plain 2-D, full-K matmul)
                pl.BlockSpec((1, D), wmap2),     # bo
                pl.BlockSpec((D, D), wmap2),     # W1
                pl.BlockSpec((1, D), wmap2),     # b1
                pl.BlockSpec((D, D), wmap2),     # W2
                pl.BlockSpec((1, D), wmap2),     # b2
            ],
            out_specs=pl.BlockSpec((1, TN, D), lambda b, qi, kv: (b, qi, 0)),
            scratch_shapes=[
                pltpu.VMEM((H, TN, hd), jnp.bfloat16),   # q (scaled, head-major)
                pltpu.VMEM((H, TN, 1), jnp.float32),     # running max
                pltpu.VMEM((H, TN, 1), jnp.float32),     # running sum
                pltpu.VMEM((H, TN, hd), jnp.float32),    # accumulator
            ]),
        compiler_params=pltpu.CompilerParams(
            dimension_semantics=("parallel", "parallel", "arbitrary"),
            vmem_limit_bytes=vmem_limit_bytes),
        cost_estimate=pl.CostEstimate(flops=flops,
                                      transcendentals=transcendentals,
                                      bytes_accessed=bytes_accessed),
    )(x, k_hm, v_hm, wq_b, wo_b, bo32, w1_b, b132, w2_b, b232)


def flash_query_layer_ref(x, c, params, num_heads):
    """Pure-JAX f32 reference (mirrors the PyTorch module)."""
    wq, wk, wv, wo, bo, w1, b1, w2, b2 = params
    mean = jnp.mean(x, axis=-1, keepdims=True)
    var = jnp.mean((x - mean) ** 2, axis=-1, keepdims=True)
    xn = (x - mean) / jnp.sqrt(var + 1e-6)

    B, N, D = x.shape
    hd = D // num_heads
    q = (xn @ wq).reshape(B, N, num_heads, hd)
    k = (c @ wk).reshape(B, c.shape[1], num_heads, hd)
    v = (c @ wv).reshape(B, c.shape[1], num_heads, hd)
    s = jnp.einsum('bnhd,bmhd->bhnm', q, k) / math.sqrt(hd)
    p = jax.nn.softmax(s, axis=-1)
    o = jnp.einsum('bhnm,bmhd->bnhd', p, v).reshape(B, N, D)
    o = o @ wo + bo[0]
    h1 = o @ w1 + b1[0]
    g = jax.nn.gelu(h1, approximate=False)
    return g @ w2 + b2[0]


if __name__ == "__main__":
    # Small shapes consistent with the module.
    B, N, M = 2, 8, 16
    dim, num_heads, dim_context = 32, 4, 16

    key = jax.random.PRNGKey(0)
    ks = jax.random.split(key, 11)

    def init_w(k, fan_in, fan_out):
        return (jax.random.normal(k, (fan_in, fan_out), jnp.float32)
                / math.sqrt(fan_in))

    x = jax.random.normal(ks[0], (B, N, dim), jnp.float32)
    c = jax.random.normal(ks[1], (B, M, dim_context), jnp.float32)

    params = (
        init_w(ks[2], dim, dim),              # Wq   (to_q, bias=False)
        init_w(ks[3], dim_context, dim),      # Wk   (to_k, bias=False)
        init_w(ks[4], dim_context, dim),      # Wv   (to_v, bias=False)
        init_w(ks[5], dim, dim),              # Wo   (to_out)
        0.01 * jax.random.normal(ks[6], (1, dim), jnp.float32),   # bo
        init_w(ks[7], dim, dim),              # W1   (ff linear 1, mult=1)
        0.01 * jax.random.normal(ks[8], (1, dim), jnp.float32),   # b1
        init_w(ks[9], dim, dim),              # W2   (ff linear 2)
        0.01 * jax.random.normal(ks[10], (1, dim), jnp.float32),  # b2
    )

    out = flash_query_layer(x, c, params, num_heads)
    out = jax.block_until_ready(out)

    ref = flash_query_layer_ref(x, c, params, num_heads)
    # bf16 MXU inputs with f32 accumulation → relaxed tolerance vs the f32 ref.
    np.testing.assert_allclose(np.asarray(out), np.asarray(ref),
                               rtol=3e-2, atol=3e-2)

    print("KERNEL_OK")
</pallas_src>

<mosaic_0001>
module attributes {stable_mosaic.version = 11 : i64} {
  func.func @_kv_proj_kernel(%arg0: i32, %arg1: i32, %arg2: memref<1x16x16xbf16, #tpu.memory_space<vmem>>, %arg3: memref<16x32xbf16, #tpu.memory_space<vmem>>, %arg4: memref<16x32xbf16, #tpu.memory_space<vmem>>, %arg5: memref<1x4x16x8xbf16, #tpu.memory_space<vmem>>, %arg6: memref<1x4x16x8xbf16, #tpu.memory_space<vmem>>) attributes {dimension_semantics = [#tpu.dimension_semantics<parallel>, #tpu.dimension_semantics<parallel>], iteration_bounds = array<i64: 2, 1>, scalar_prefetch = 0 : i64, scratch_operands = 0 : i64, tpu.core_type = #tpu.core_type<tc>, window_params = [{transform_indices = @transform_0, window_bounds = array<i64: 1, 16, 16>}, {pipeline_mode = #tpu.pipeline_mode<synchronous>, transform_indices = @transform_1, window_bounds = array<i64: 16, 32>}, {pipeline_mode = #tpu.pipeline_mode<synchronous>, transform_indices = @transform_2, window_bounds = array<i64: 16, 32>}, {transform_indices = @transform_3, window_bounds = array<i64: 1, 4, 16, 8>}, {transform_indices = @transform_4, window_bounds = array<i64: 1, 4, 16, 8>}]} {
    %c0 = arith.constant 0 : index
    %c0_0 = arith.constant 0 : index
    %c0_1 = arith.constant 0 : index
    %0 = vector.load %arg2[%c0, %c0_0, %c0_1] : memref<1x16x16xbf16, #tpu.memory_space<vmem>>, vector<1x16x16xbf16>
    %1 = vector.shape_cast %0 : vector<1x16x16xbf16> to vector<16x16xbf16>
    %c0_2 = arith.constant 0 : index
    %c0_3 = arith.constant 0 : index
    %2 = vector.load %arg3[%c0_2, %c0_3] : memref<16x32xbf16, #tpu.memory_space<vmem>>, vector<16x32xbf16>
    %cst = arith.constant dense<0.000000e+00> : vector<16x32xf32>
    %3 = tpu.matmul %1, %2, %cst {dimension_numbers = #tpu.dot_dimension_numbers<[1], [0], [0], [1], [0, 0, 1, 1], [], []>} : vector<16x16xbf16>, vector<16x32xbf16>, vector<16x32xf32> -> vector<16x32xf32>
    %c0_4 = arith.constant 0 : index
    %c0_5 = arith.constant 0 : index
    %4 = vector.load %arg4[%c0_4, %c0_5] : memref<16x32xbf16, #tpu.memory_space<vmem>>, vector<16x32xbf16>
    %cst_6 = arith.constant dense<0.000000e+00> : vector<16x32xf32>
    %5 = tpu.matmul %1, %4, %cst_6 {dimension_numbers = #tpu.dot_dimension_numbers<[1], [0], [0], [1], [0, 0, 1, 1], [], []>} : vector<16x16xbf16>, vector<16x32xbf16>, vector<16x32xf32> -> vector<16x32xf32>
    %6 = vector.extract_strided_slice %3 {offsets = [0, 0], sizes = [16, 8], strides = [1, 1]} : vector<16x32xf32> to vector<16x8xf32>
    %7 = arith.truncf %6 : vector<16x8xf32> to vector<16x8xbf16>
    %c0_7 = arith.constant 0 : index
    %c0_8 = arith.constant 0 : index
    %c0_9 = arith.constant 0 : index
    %c0_10 = arith.constant 0 : index
    %8 = vector.load %arg5[%c0_7, %c0_8, %c0_9, %c0_10] : memref<1x4x16x8xbf16, #tpu.memory_space<vmem>>, vector<1x1x16x8xbf16>
    %9 = vector.shape_cast %8 : vector<1x1x16x8xbf16> to vector<16x8xbf16>
    %10 = vector.shape_cast %7 : vector<16x8xbf16> to vector<1x1x16x8xbf16>
    tpu.vector_store %arg5[%c0_7, %c0_8, %c0_9, %c0_10], %10 {strides = array<i32>} : memref<1x4x16x8xbf16, #tpu.memory_space<vmem>>, vector<1x1x16x8xbf16>,
    %11 = vector.extract_strided_slice %5 {offsets = [0, 0], sizes = [16, 8], strides = [1, 1]} : vector<16x32xf32> to vector<16x8xf32>
    %12 = arith.truncf %11 : vector<16x8xf32> to vector<16x8xbf16>
    %c0_11 = arith.constant 0 : index
    %c0_12 = arith.constant 0 : index
    %c0_13 = arith.constant 0 : index
    %c0_14 = arith.constant 0 : index
    %13 = vector.load %arg6[%c0_11, %c0_12, %c0_13, %c0_14] : memref<1x4x16x8xbf16, #tpu.memory_space<vmem>>, vector<1x1x16x8xbf16>
    %14 = vector.shape_cast %13 : vector<1x1x16x8xbf16> to vector<16x8xbf16>
    %15 = vector.shape_cast %12 : vector<16x8xbf16> to vector<1x1x16x8xbf16>
    tpu.vector_store %arg6[%c0_11, %c0_12, %c0_13, %c0_14], %15 {strides = array<i32>} : memref<1x4x16x8xbf16, #tpu.memory_space<vmem>>, vector<1x1x16x8xbf16>,
    %16 = vector.extract_strided_slice %3 {offsets = [0, 8], sizes = [16, 8], strides = [1, 1]} : vector<16x32xf32> to vector<16x8xf32>
    %17 = arith.truncf %16 : vector<16x8xf32> to vector<16x8xbf16>
    %c0_15 = arith.constant 0 : index
    %c1 = arith.constant 1 : index
    %c0_16 = arith.constant 0 : index
    %c0_17 = arith.constant 0 : index
    %18 = vector.load %arg5[%c0_15, %c1, %c0_16, %c0_17] : memref<1x4x16x8xbf16, #tpu.memory_space<vmem>>, vector<1x1x16x8xbf16>
    %19 = vector.shape_cast %18 : vector<1x1x16x8xbf16> to vector<16x8xbf16>
    %20 = vector.shape_cast %17 : vector<16x8xbf16> to vector<1x1x16x8xbf16>
    tpu.vector_store %arg5[%c0_15, %c1, %c0_16, %c0_17], %20 {strides = array<i32>} : memref<1x4x16x8xbf16, #tpu.memory_space<vmem>>, vector<1x1x16x8xbf16>,
    %21 = vector.extract_strided_slice %5 {offsets = [0, 8], sizes = [16, 8], strides = [1, 1]} : vector<16x32xf32> to vector<16x8xf32>
    %22 = arith.truncf %21 : vector<16x8xf32> to vector<16x8xbf16>
    %c0_18 = arith.constant 0 : index
    %c1_19 = arith.constant 1 : index
    %c0_20 = arith.constant 0 : index
    %c0_21 = arith.constant 0 : index
    %23 = vector.load %arg6[%c0_18, %c1_19, %c0_20, %c0_21] : memref<1x4x16x8xbf16, #tpu.memory_space<vmem>>, vector<1x1x16x8xbf16>
    %24 = vector.shape_cast %23 : vector<1x1x16x8xbf16> to vector<16x8xbf16>
    %25 = vector.shape_cast %22 : vector<16x8xbf16> to vector<1x1x16x8xbf16>
    tpu.vector_store %arg6[%c0_18, %c1_19, %c0_20, %c0_21], %25 {strides = array<i32>} : memref<1x4x16x8xbf16, #tpu.memory_space<vmem>>, vector<1x1x16x8xbf16>,
    %26 = vector.extract_strided_slice %3 {offsets = [0, 16], sizes = [16, 8], strides = [1, 1]} : vector<16x32xf32> to vector<16x8xf32>
    %27 = arith.truncf %26 : vector<16x8xf32> to vector<16x8xbf16>
    %c0_22 = arith.constant 0 : index
    %c2 = arith.constant 2 : index
    %c0_23 = arith.constant 0 : index
    %c0_24 = arith.constant 0 : index
    %28 = vector.load %arg5[%c0_22, %c2, %c0_23, %c0_24] : memref<1x4x16x8xbf16, #tpu.memory_space<vmem>>, vector<1x1x16x8xbf16>
    %29 = vector.shape_cast %28 : vector<1x1x16x8xbf16> to vector<16x8xbf16>
    %30 = vector.shape_cast %27 : vector<16x8xbf16> to vector<1x1x16x8xbf16>
    tpu.vector_store %arg5[%c0_22, %c2, %c0_23, %c0_24], %30 {strides = array<i32>} : memref<1x4x16x8xbf16, #tpu.memory_space<vmem>>, vector<1x1x16x8xbf16>,
    %31 = vector.extract_strided_slice %5 {offsets = [0, 16], sizes = [16, 8], strides = [1, 1]} : vector<16x32xf32> to vector<16x8xf32>
    %32 = arith.truncf %31 : vector<16x8xf32> to vector<16x8xbf16>
    %c0_25 = arith.constant 0 : index
    %c2_26 = arith.constant 2 : index
    %c0_27 = arith.constant 0 : index
    %c0_28 = arith.constant 0 : index
    %33 = vector.load %arg6[%c0_25, %c2_26, %c0_27, %c0_28] : memref<1x4x16x8xbf16, #tpu.memory_space<vmem>>, vector<1x1x16x8xbf16>
    %34 = vector.shape_cast %33 : vector<1x1x16x8xbf16> to vector<16x8xbf16>
    %35 = vector.shape_cast %32 : vector<16x8xbf16> to vector<1x1x16x8xbf16>
    tpu.vector_store %arg6[%c0_25, %c2_26, %c0_27, %c0_28], %35 {strides = array<i32>} : memref<1x4x16x8xbf16, #tpu.memory_space<vmem>>, vector<1x1x16x8xbf16>,
    %36 = vector.extract_strided_slice %3 {offsets = [0, 24], sizes = [16, 8], strides = [1, 1]} : vector<16x32xf32> to vector<16x8xf32>
    %37 = arith.truncf %36 : vector<16x8xf32> to vector<16x8xbf16>
    %c0_29 = arith.constant 0 : index
    %c3 = arith.constant 3 : index
    %c0_30 = arith.constant 0 : index
    %c0_31 = arith.constant 0 : index
    %38 = vector.load %arg5[%c0_29, %c3, %c0_30, %c0_31] : memref<1x4x16x8xbf16, #tpu.memory_space<vmem>>, vector<1x1x16x8xbf16>
    %39 = vector.shape_cast %38 : vector<1x1x16x8xbf16> to vector<16x8xbf16>
    %40 = vector.shape_cast %37 : vector<16x8xbf16> to vector<1x1x16x8xbf16>
    tpu.vector_store %arg5[%c0_29, %c3, %c0_30, %c0_31], %40 {strides = array<i32>} : memref<1x4x16x8xbf16, #tpu.memory_space<vmem>>, vector<1x1x16x8xbf16>,
    %41 = vector.extract_strided_slice %5 {offsets = [0, 24], sizes = [16, 8], strides = [1, 1]} : vector<16x32xf32> to vector<16x8xf32>
    %42 = arith.truncf %41 : vector<16x8xf32> to vector<16x8xbf16>
    %c0_32 = arith.constant 0 : index
    %c3_33 = arith.constant 3 : index
    %c0_34 = arith.constant 0 : index
    %c0_35 = arith.constant 0 : index
    %43 = vector.load %arg6[%c0_32, %c3_33, %c0_34, %c0_35] : memref<1x4x16x8xbf16, #tpu.memory_space<vmem>>, vector<1x1x16x8xbf16>
    %44 = vector.shape_cast %43 : vector<1x1x16x8xbf16> to vector<16x8xbf16>
    %45 = vector.shape_cast %42 : vector<16x8xbf16> to vector<1x1x16x8xbf16>
    tpu.vector_store %arg6[%c0_32, %c3_33, %c0_34, %c0_35], %45 {strides = array<i32>} : memref<1x4x16x8xbf16, #tpu.memory_space<vmem>>, vector<1x1x16x8xbf16>,
    return
  }
  func.func @transform_0(%arg0: i32, %arg1: i32) -> (i32, i32, i32) {
    %c0_i32 = arith.constant 0 : i32
    %c0_i32_0 = arith.constant 0 : i32
    return %arg0, %arg1, %c0_i32 : i32, i32, i32
  }
  func.func @transform_1(%arg0: i32, %arg1: i32) -> (i32, i32) {
    %c0_i32 = arith.constant 0 : i32
    %c0_i32_0 = arith.constant 0 : i32
    %c0_i32_1 = arith.constant 0 : i32
    return %c0_i32, %c0_i32_0 : i32, i32
  }
  func.func @transform_2(%arg0: i32, %arg1: i32) -> (i32, i32) {
    %c0_i32 = arith.constant 0 : i32
    %c0_i32_0 = arith.constant 0 : i32
    %c0_i32_1 = arith.constant 0 : i32
    return %c0_i32, %c0_i32_0 : i32, i32
  }
  func.func @transform_3(%arg0: i32, %arg1: i32) -> (i32, i32, i32, i32) {
    %c0_i32 = arith.constant 0 : i32
    %c0_i32_0 = arith.constant 0 : i32
    %c0_i32_1 = arith.constant 0 : i32
    return %arg0, %c0_i32, %arg1, %c0_i32_0 : i32, i32, i32, i32
  }
  func.func @transform_4(%arg0: i32, %arg1: i32) -> (i32, i32, i32, i32) {
    %c0_i32 = arith.constant 0 : i32
    %c0_i32_0 = arith.constant 0 : i32
    %c0_i32_1 = arith.constant 0 : i32
    return %arg0, %c0_i32, %arg1, %c0_i32_0 : i32, i32, i32, i32
  }
}

</mosaic_0001>

<bundles_post_ra>
// kernel: tpu_custom_call.1
= control target key start
LH: loop header
LB: loop body
LE: loop exit
PB: predicated region body
PF: predicated region fallthrough
CT: control target
= control target key end

     0   :  { %10 = vsyncpa [#allocation3], 0  ;;  %s1215_s0 = inlined_call_operand.hbm [shape: bf16[2,16,16], index: 0, kind: input, shape index: {}]   ;;  %s1216_s1 = inlined_call_operand.hbm [shape: bf16[16,32], index: 1, kind: input, shape index: {}]   ;;  %s1217_s2 = inlined_call_operand.hbm [shape: bf16[16,32], index: 2, kind: input, shape index: {}]   ;;  %s1218_s3 = inlined_call_operand.vmem [shape: bf16[2,4,16,8], index: 3, kind: output, shape index: {0}]   ;;  %s1219_s4 = inlined_call_operand.vmem [shape: bf16[2,4,16,8], index: 4, kind: output, shape index: {1}]  }
   0x1   :  { %12 = vsyncpa [#allocation3 + $0x1], 0 }
   0x2   :  { %13 = vsyncpa [#allocation5], 0  ;;  %s974_s15 = smov 0   ;;  %s976_s16 = smov 0  }
   0x3   :  { %s978_s17 = smov 0   ;;  %s980_s18 = smov 0  }
   0x4   :  { %s982_s19 = smov 0   ;;  %s984_s20 = smov 0  }
   0x5 LB: > { %s648_s21 = sadd.s32 4294967295, %s937_s20   ;;  %p53_p0 = scmp.ne.s32.totalorder %s921_s16, %s917_s15  ;;  %s937_s20 = sphi %s984_s20, %s19_s20   ;;  %s933_s19 = sphi %s982_s19, %s1236_s19   ;;  %s929_s18 = sphi %s980_s18, %s1235_s18   ;;  %s925_s17 = sphi %s978_s17, %s1234_s17   ;;  %s921_s16 = sphi %s976_s16, %s1233_s16   ;;  %s917_s15 = sphi %s974_s15, %s1232_s15  }
   0x6   : > { %p1004_p1 = scmp.eq.s32.totalorder %s648_s21, 0  ;;  %p650_p2 = scmp.ge.s32.totalorder %s937_s20, 1 }
   0x7   : > { %p162_p3 = scmp.lt.s32.totalorder %s937_s20, 3  ;;  %s939_s25 = smov [#allocation4]  }
   0x8   : > { %s1224_s22 = scalar_select %p1004_p1, 1, 0 }
   0x9   : > { %p1012_p4 = por %p1004_p1, %p53_p0  ;;  %p1016_p5 = pnand %p650_p2, %p162_p3 }
   0xa   : > { %s174_s26 = sshll.u32 %s939_s25, 4  ;;  %s940_s28 = smov [#allocation6]   ;;  %s175_s26 = int_to_ptr.vmem [resolvable:$true] %s174_s26 }
   0xb   : > { %s1225_s23 = scalar_select %p1012_p4, 1, 0 }
   0xc   : > { %s1226_s24 = scalar_select %p1016_p5, 1, 0 }
   0xd   : > { %p721_p6 = pneg %p1016_p5  ;;  %s187_s29 = sshll.u32 %s940_s28, 4  ;;  %s1028_s29 = int_to_ptr.vmem [resolvable:$true] %s187_s29 }
   0xe   : > { %s797_s6 = scalar_lea.hbm %s1216_s1, 128 }
   0xf   : > { %p1024_p7 = pnand %p721_p6, %p1004_p1  ;;  %p798_p8 = scmp.ne.s32.totalorder %s1216_s1, %s797_s6 }
  0x10   : > { %p804_p12 = scmp.lt.u32.totalorder %s797_s6, %s1216_s1 }
  0x11   : > { %p799_p9 = pneg %p1024_p7 }
  0x13   : > { %p800_p10 = pnand %p799_p9, %p798_p8 }
  0x15   : > { %p801_p11 = pneg %p800_p10 }
  0x17   : > { %p806_p13 = pnand %p804_p12, %p801_p11 }
  0x19   : > { %809 = shalt.err (!%p806_p13)
}
  0x1a   : > { %s810_s11 = scalar_lea.vmem %s175_s26, 128  ;;  %p818_p6 = scmp.lt.s32.totalorder %s175_s26, %s175_s26 }
  0x1b   : > { %p811_p0 = scmp.ne.s32.totalorder %s175_s26, %s810_s11  ;;  %p819_p1 = scmp.lt.s32.totalorder %s810_s11, %s810_s11 }
  0x1d   : > { %p813_p2 = pnand %p811_p0, %p799_p9  ;;  %p820_p4 = por %p819_p1, %p818_p6 }
  0x1f   : > { %p814_p3 = pneg %p813_p2 }
  0x21   : > { %p821_p5 = pnand %p820_p4, %p814_p3 }
  0x23   : > { %824 = shalt.err (!%p821_p5)
}
  0x24   : > { %s941_s12 = smov 64   ;;  %s942_s13 = smov 4  }
  0x25   : > { %724 = dma.hbm_to_vmem [thread:$0]  (!%p1024_p7), %s1216_s1, 128, %s175_s26, [#allocation5], %s941_s12, %s941_s12, %s942_s13  }
  0x26   : > { %s825_s28 = scalar_lea.hbm %s1217_s2, 128 }
  0x27   : > { %p826_p1 = scmp.ne.s32.totalorder %s1217_s2, %s825_s28  ;;  %p832_p8 = scmp.lt.u32.totalorder %s825_s28, %s1217_s2 }
  0x29   : > { %p828_p4 = pnand %p826_p1, %p799_p9 }
  0x2b   : > { %p829_p5 = pneg %p828_p4 }
  0x2d   : > { %p834_p10 = pnand %p832_p8, %p829_p5 }
  0x2f   : > { %837 = shalt.err (!%p834_p10)
}
  0x30   : > { %s838_s26 = scalar_lea.vmem %s1028_s29, 128  ;;  %p846_p0 = scmp.lt.s32.totalorder %s1028_s29, %s1028_s29 }
  0x31   : > { %p839_p11 = scmp.ne.s32.totalorder %s1028_s29, %s838_s26  ;;  %p847_p2 = scmp.lt.s32.totalorder %s838_s26, %s838_s26 }
  0x33   : > { %p841_p12 = pnand %p839_p11, %p799_p9  ;;  %p848_p3 = por %p847_p2, %p846_p0 }
  0x35   : > { %p842_p13 = pneg %p841_p12 }
  0x37   : > { %p849_p6 = pnand %p848_p3, %p842_p13 }
  0x39   : > { %852 = shalt.err (!%p849_p6)
}
  0x3a   : > { %727 = dma.hbm_to_vmem [thread:$0]  (!%p1024_p7), %s1217_s2, 128, %s1028_s29, [#allocation5], %s941_s12, %s941_s12, %s942_s13  }
  0x3b   : > { %s31_s10 = sadd.s32 1, %s933_s19  ;;  %s40_s27 = sadd.s32 1, %s925_s17 }
  0x3c   : > { %p33_p9 = scmp.ge.s32.totalorder %s31_s10, 2  ;;  %p47_p1 = scmp.ne.s32.totalorder %s925_s17, %s921_s16 }
  0x3d   : > { %p48_p4 = scmp.eq.s32.totalorder %s937_s20, 0  ;;  %p734_p5 = scmp.lt.s32.totalorder %s937_s20, 2 }
  0x3e   : > { %s1238_s10 = smov (%p33_p9, %s31_s10), 0  ;;  %s201_s11 = sand.u32 1, %s925_s17  }
  0x3f   : > { %p49_p8 = por %p48_p4, %p47_p1  ;;  %s35_s14 = ssub.s32 %s933_s19, %s1238_s10 }
  0x40   : > { %p38_p10 = scmp.eq.s32.totalorder %s35_s14, 0  ;;  %s654_s15 = sshll.u32 %s201_s11, 3 }
  0x41   : > { %s688_s21 = sshll.u32 %s933_s19, 7  ;;  %s205_s5 = scalar_lea.vmem [#allocation2], %s654_s15 }
  0x42   : > { %s1096_s25 = scalar_select %p38_p10, %s925_s17, %s40_s27  }
  0x43   : > { %s1101_s30 = scalar_lea.hbm %s1215_s0, %s688_s21  ;;  %s214_s6 = sshll.u32 %s205_s5, 4  ;;  %s1103_s6 = int_to_ptr.vmem [resolvable:$true] %s214_s6 }
  0x44   : > { %p1107_p7 = pnand %p734_p5, %p49_p8  ;;  %s1111_s26 = scalar_lea.sflag [#allocation3], %s201_s11 }
  0x45   : > { %s853_s8 = scalar_lea.hbm %s1101_s30, 128  ;;  %s858_s14 = scalar_lea.hbm %s1215_s0, 256 }
  0x46   : > { %p854_p11 = scmp.ne.s32.totalorder %s1101_s30, %s853_s8  ;;  %p855_p12 = pneg %p1107_p7 }
  0x47   : > { %p859_p2 = scmp.lt.u32.totalorder %s1101_s30, %s1215_s0  ;;  %p860_p3 = scmp.lt.u32.totalorder %s858_s14, %s853_s8 }
  0x48   : > { %p856_p13 = pnand %p855_p12, %p854_p11  ;;  %p862_p9 = scmp.lt.u32.totalorder %s853_s8, %s1101_s30 }
  0x49   : > { %p861_p6 = por %p860_p3, %p859_p2 }
  0x4a   : > { %p857_p0 = pneg %p856_p13 }
  0x4b   : > { %p863_p1 = por %p862_p9, %p861_p6 }
  0x4d   : > { %p864_p4 = pnand %p863_p1, %p857_p0 }
  0x4f   : > { %867 = shalt.err (!%p864_p4)
}
  0x50   : > { %s868_s11 = scalar_lea.vmem %s1103_s6, 128  ;;  %s943_s28 = smov [#allocation2]  }
  0x51   : > { %p869_p5 = scmp.ne.s32.totalorder %s1103_s6, %s868_s11  ;;  %s873_s29 = sshll.u32 %s943_s28, 4  ;;  %s874_s29 = int_to_ptr.vmem [resolvable:$false] %s873_s29 }
  0x52   : > { %s875_s5 = scalar_lea.vmem %s874_s29, 256  ;;  %p876_p11 = scmp.lt.s32.totalorder %s1103_s6, %s874_s29 }
  0x53   : > { %p871_p8 = pnand %p869_p5, %p855_p12  ;;  %p877_p13 = scmp.lt.s32.totalorder %s875_s5, %s868_s11 }
  0x55   : > { %p872_p10 = pneg %p871_p8  ;;  %p878_p2 = por %p877_p13, %p876_p11 }
  0x57   : > { %p879_p3 = pnand %p878_p2, %p872_p10 }
  0x59   : > { %882 = shalt.err (!%p879_p3)
}
  0x5a   : > { %731 = dma.hbm_to_vmem [thread:$0]  (!%p1107_p7), %s1101_s30, 128, %s1103_s6, %s1111_s26, %s941_s12, %s941_s12, %s942_s13  }
  0x5b   : > { %p1229_p12 = scmp.ne.s32.totalorder %s1226_s24, 0 }
  0x5c   : > { %s228_s8 = sand.u32 (!%p1229_p12), 1, %s921_s16   ;;  %p1230_p0 = scmp.ne.s32.totalorder (!%p1229_p12), %s1225_s23, 0 }
  0x5d   : > { %226 = sbr.rel (%p1229_p12) target bundleno = 460 (0x1cc), region = 32  ;;  %s658_s9 = sshll.u32 (!%p1229_p12), %s228_s8, 3 }
  0x5e   : > { %s229_s27 = scalar_lea.sflag (!%p1229_p12), [#allocation3], %s228_s8  ;;  %s232_s14 = scalar_lea.vmem (!%p1229_p12), [#allocation2], %s658_s9 }
  0x64   : > { %908 = dma.done.wait (%p1230_p0), %s229_s27, 128  }
  0x65   : > { %910 = vsyncadd (%p1230_p0), %s229_s27, 4294967168  ;;  %p1231_p6 = scmp.ne.s32.totalorder %s1224_s22, 0 }
  0x67   : > { %912 = dma.done.wait (%p1231_p6), [#allocation5], 256  }
  0x68   : > { %914 = vsyncadd (%p1231_p6), [#allocation5], 4294967040  ;;  %v944_v0 = vmov 0.0   ;;  %vm945_vm0 = vmmov 0   ;;  %v794_v1 = vld [vmem:[#allocation4] sm:$0xff]   ;;  %v795_v2 = vld [vmem:[#allocation6] sm:$0xff]  }
  0x69   : > { %699 = vmatprep.subr.bf16.mxu0 %v944_v0  ;;  %705 = vmatprep.subr.bf16.mxu1 %v944_v0  ;;  %v796_v3 = vld [vmem:[%s232_s14] sm:$0xff]   ;;  %vm315_vm1 = vcmask 130048   ;;  %p280_p7 = scmp.lt.s32.totalorder %s929_s18, 1  ;;  %vm417_vm2 = vcmask 60416   ;;  %s947_s7 = smov 112  }
  0x6a   : > { %701 = vmatprep.mubr.msk.bf16.mxu0 %vm945_vm0, %v944_v0  ;;  %707 = vmatprep.mubr.msk.bf16.mxu1 %vm945_vm0, %v944_v0  ;;  %s948_s26 = smov 104  }
  0x6b   : > { %700 = vmatpush3.bf16.msra.mxu0 %v794_v1  ;;  %706 = vmatpush3.bf16.msra.mxu1 %v795_v2  ;;  %s1240_s18 = smov (!%p280_p7, %s929_s18), 1 }
  0x6c   : > { %s689_s22 = sshll.u32 %s1240_s18, 5  ;;  %s946_s18 = smov 120  }
  0x6d   : > { %s1158_s12 = scalar_lea.vmem %s1218_s3, %s689_s22  ;;  %s1163_s6 = scalar_lea.vmem %s1219_s4, %s689_s22 }
  0x6e   : > { %702 = vmatmul.mubr.msk.bf16.vlgmr.msra.gmra.mrb[0].mxu0 %vm315_vm1, %v796_v3  ;;  %708 = vmatmul.mubr.msk.bf16.vlgmr.msra.gmra.mrb[0].mxu1 %vm315_vm1, %v796_v3 }
 0x141   : > { %v353_v4 = vpop.f32.mrb[0].mxu0  ;;  %v402_v6 = vpop.f32.mrb[0].mxu1 }
 0x142   : > { %v691_v5 = vpack.c.bf16 %v353_v4, %v353_v4  ;;  %v703_v7 = vpop.f32.mrb[1].mxu0  ;;  %v693_v8 = vpack.c.bf16 %v402_v6, %v402_v6  ;;  %v709_v9 = vpop.f32.mrb[1].mxu1 }
 0x143   : > { %v356_v10 = vpop.f32.mrb[2].mxu0  ;;  %v405_v12 = vpop.f32.mrb[2].mxu1 }
 0x144   : > { %418 = vst.msk [vmem:[%s1158_s12] sm:$0xf] %vm417_vm2, %v691_v5  ;;  %v692_v11 = vpack.c.bf16 %v356_v10, %v356_v10  ;;  %430 = vrot.lane.b32.xlu0 %v691_v5, %s946_s18  ;;  %v704_v13 = vpop.f32.mrb[3].mxu0  ;;  %428 = vst.msk [vmem:[%s1163_s6] sm:$0xf] %vm417_vm2, %v693_v8  ;;  %v694_v14 = vpack.c.bf16 %v405_v12, %v405_v12  ;;  %439 = vrot.lane.b32.xlu1 %v693_v8, %s946_s18  ;;  %v710_v15 = vpop.f32.mrb[3].mxu1 }
 0x146   : > { %419 = vst.msk [vmem:[%s1158_s12 + $0x4] sm:$0xf] %vm417_vm2, %v692_v11  ;;  %429 = vst.msk [vmem:[%s1163_s6 + $0x4] sm:$0xf] %vm417_vm2, %v694_v14 }
 0x148   : > { %448 = vrot.lane.b32.xlu0 %v691_v5, %s947_s7  ;;  %441 = vrot.lane.b32.xlu1 %v694_v14, %s946_s18 }
 0x14c   : > { %457 = vrot.lane.b32.xlu0 %v693_v8, %s947_s7  ;;  %450 = vrot.lane.b32.xlu1 %v692_v11, %s947_s7 }
 0x150   : > { %466 = vrot.lane.b32.xlu0 %v691_v5, %s948_s26  ;;  %459 = vrot.lane.b32.xlu1 %v694_v14, %s947_s7 }
 0x154   : > { %432 = vrot.lane.b32.xlu0 %v692_v11, %s946_s18  ;;  %468 = vrot.lane.b32.xlu1 %v692_v11, %s948_s26 }
 0x158   : > { %475 = vrot.lane.b32.xlu0 %v693_v8, %s948_s26  ;;  %477 = vrot.lane.b32.xlu1 %v694_v14, %s948_s26 }
 0x1b6   : > { %v431_v16 = vpop.permute.xlu0 %430  ;;  %v440_v17 = vpop.permute.xlu1 %439 }
 0x1b7   : > { %674 = vst.msk [vmem:[%s1158_s12 + $0x8] sm:$0xf] %vm417_vm2, %v431_v16  ;;  %676 = vst.msk [vmem:[%s1163_s6 + $0x8] sm:$0xf] %vm417_vm2, %v440_v17 }
 0x1ba   : > { %v449_v18 = vpop.permute.xlu0 %448  ;;  %v442_v19 = vpop.permute.xlu1 %441 }
 0x1bb   : > { %678 = vst.msk [vmem:[%s1158_s12 + $0x10] sm:$0xf] %vm417_vm2, %v449_v18  ;;  %677 = vst.msk [vmem:[%s1163_s6 + $0xc] sm:$0xf] %vm417_vm2, %v442_v19 }
 0x1be   : > { %v458_v20 = vpop.permute.xlu0 %457  ;;  %v451_v21 = vpop.permute.xlu1 %450 }
 0x1bf   : > { %680 = vst.msk [vmem:[%s1163_s6 + $0x10] sm:$0xf] %vm417_vm2, %v458_v20  ;;  %679 = vst.msk [vmem:[%s1158_s12 + $0x14] sm:$0xf] %vm417_vm2, %v451_v21 }
 0x1c2   : > { %v467_v22 = vpop.permute.xlu0 %466  ;;  %v460_v23 = vpop.permute.xlu1 %459 }
 0x1c3   : > { %682 = vst.msk [vmem:[%s1158_s12 + $0x18] sm:$0xf] %vm417_vm2, %v467_v22  ;;  %681 = vst.msk [vmem:[%s1163_s6 + $0x14] sm:$0xf] %vm417_vm2, %v460_v23 }
 0x1c6   : > { %v433_v24 = vpop.permute.xlu0 %432  ;;  %v469_v25 = vpop.permute.xlu1 %468 }
 0x1c7   : > { %675 = vst.msk [vmem:[%s1158_s12 + $0xc] sm:$0xf] %vm417_vm2, %v433_v24  ;;  %683 = vst.msk [vmem:[%s1158_s12 + $0x1c] sm:$0xf] %vm417_vm2, %v469_v25 }
 0x1ca   : > { %v476_v26 = vpop.permute.xlu0 %475  ;;  %v478_v27 = vpop.permute.xlu1 %477 }
 0x1cb   : > { %684 = vst.msk [vmem:[%s1163_s6 + $0x18] sm:$0xf] %vm417_vm2, %v476_v26  ;;  %685 = vst.msk [vmem:[%s1163_s6 + $0x1c] sm:$0xf] %vm417_vm2, %v478_v27 }
 0x1cc PF: > { %s19_s20 = sadd.s32 1, %s937_s20   ;;  %s1232_s15 = smov %s921_s16 }
 0x1cd   : > { %p16_p9 = scmp.ge.s32.totalorder %s19_s20, 4   ;;  %s1233_s16 = smov %s925_s17 }
 0x1ce   : > { %s1234_s17 = smov %s1096_s25  ;;  %s1235_s18 = smov %s933_s19 }
 0x1cf   : > { %s1236_s19 = smov %s1238_s10  ;;  %18 = sbr.rel (!%p16_p9) target bundleno = 5 (0x5), region = 98 }
 0x1d6   :  { %539 = vsyncpa [#allocation3], 1 }
 0x1d7   :  { %541 = vsyncpa [#allocation3 + $0x1], 1 }
 0x1d8   :  { %542 = vsyncpa [#allocation5], 1 }

</bundles_post_ra>
